<compile_context>
chip_gen: v7x
topology: tpu7x:2x2x1
jax: 0.10.0
libtpu: 0.0.40
codegen_flags: <defaults>
</compile_context>

<pallas_src>
import math

import numpy as np
import jax
import jax.numpy as jnp
from jax.experimental import pallas as pl
from jax.experimental.pallas import tpu as pltpu


# ---------------------------------------------------------------------------
# Parameter / buffer construction (plain JAX glue)
# ---------------------------------------------------------------------------
def positional_encoding_table(seq_len, embed_dim):
    """Rows [0, seq_len) of PositionalEncoding's buffer (value-identical to the
    PyTorch max_len=100 buffer sliced to [:seq_len]; extends consistently for
    seq_len > 100)."""
    position = np.arange(seq_len, dtype=np.float32)[:, None]
    div_term = np.exp(
        np.arange(0, embed_dim, 2, dtype=np.float32)
        * -(math.log(10000.0) / embed_dim)
    )
    pe = np.zeros((seq_len, embed_dim), dtype=np.float32)
    pe[:, 0::2] = np.sin(position * div_term)
    pe[:, 1::2] = np.cos(position * div_term)
    return jnp.asarray(pe)


def init_params(key, feature_dim, embed_dim, lape_dim):
    """Deterministic synthetic init (uniform, Linear-style fan-in scaling)."""
    k1, k2, k3, k4 = jax.random.split(key, 4)
    sv = 1.0 / math.sqrt(feature_dim)
    ss = 1.0 / math.sqrt(lape_dim)
    return {
        # value_embedding.token_embed : Linear(feature_dim, embed_dim)
        "wv": jax.random.uniform(k1, (feature_dim, embed_dim), jnp.float32, -sv, sv),
        "bv": jax.random.uniform(k2, (embed_dim,), jnp.float32, -sv, sv),
        # spatial_embedding.embedding_lap_pos_enc : Linear(lape_dim, embed_dim)
        "ws": jax.random.uniform(k3, (lape_dim, embed_dim), jnp.float32, -ss, ss),
        "bs": jax.random.uniform(k4, (embed_dim,), jnp.float32, -ss, ss),
    }


# ---------------------------------------------------------------------------
# Pallas kernel
# ---------------------------------------------------------------------------
def _data_embedding_kernel(x_ref, w_ref, add_ref, out_ref):
    # x_ref   : (rp, P*Ctot)  P packed rows' channels per packed row
    # w_ref   : (P*Ctot, P*D) block-diagonal packed value-embedding weight
    # add_ref : (rp, P*D)     precomputed  bv + PE[t] + 2*(lap_mx @ Ws + bs)
    # out_ref : (rp, P*D)     lane-dense (P*D is a multiple of 128 for D=32)
    out_ref[...] = (
        jnp.dot(x_ref[...], w_ref[...], preferred_element_type=jnp.float32)
        + add_ref[...]
    )


def _round_up(a, m):
    return ((a + m - 1) // m) * m


def data_embedding_forward(x, lap_mx, params, feature_dim, *, max_packed_rows=4096):
    """x: (B, T, N, Ctot >= feature_dim) f32, lap_mx: (N, lape_dim) f32.
    Returns (out, out) -- both PyTorch list entries alias the same tensor."""
    B, T, N, Ctot = x.shape
    F = feature_dim
    D = params["wv"].shape[1]

    # Lane-packing factor: pack P consecutive rows into one 128-lane-dense row.
    if D % 128 == 0:
        P = 1                      # already lane-dense
    elif 128 % D == 0:
        P = 128 // D               # e.g. D=32 -> P=4
    else:
        P = 1                      # TODO(synk): masked stores for odd D

    R0 = T * N                                 # rows per batch
    Rp = -(-R0 // P)                           # packed rows per batch
    rp = min(max_packed_rows, _round_up(Rp, 8))  # packed rows per grid step
    Rp_pad = _round_up(Rp, rp)                 # padded packed rows (exact grid)
    J = Rp_pad // rp
    pad_rows = Rp_pad * P - R0

    # Loop-invariant additive term, computed ONCE (tiny: T*N*D floats):
    #   bv + PE[t] + 2 * (lap_mx @ Ws + bs)
    pe = positional_encoding_table(T, D)                              # (T, D)
    spa = lap_mx @ params["ws"] + params["bs"]                        # (N, D)
    add = (pe[:, None, :] + 2.0 * spa[None, :, :] + params["bv"])     # (T, N, D)
    add = add.reshape(R0, D)

    # Block-diagonal packed weight: P copies of Wv on the diagonal, zero rows
    # for the Ctot - F unused trailing channels (so no input slice is needed).
    wv_full = jnp.zeros((Ctot, D), jnp.float32).at[:F, :].set(params["wv"])
    w_pack = jnp.einsum(
        "pq,cd->pcqd", jnp.eye(P, dtype=jnp.float32), wv_full
    ).reshape(P * Ctot, P * D)

    # Free row-major reshapes (+ zero-pad only when needed).
    x2 = x.reshape(B, R0, Ctot)
    if pad_rows:
        x2 = jnp.pad(x2, ((0, 0), (0, pad_rows), (0, 0)))
        add = jnp.pad(add, ((0, pad_rows), (0, 0)))
    x_pack = x2.reshape(B, Rp_pad, P * Ctot)
    add_pack = add.reshape(Rp_pad, P * D)

    cost = pl.CostEstimate(
        flops=2 * B * Rp_pad * (P * Ctot) * (P * D),
        transcendentals=0,
        bytes_accessed=4 * (B * Rp_pad * P * Ctot        # x read
                            + Rp_pad * P * D             # add read (once per j)
                            + P * Ctot * P * D           # weight (resident)
                            + B * Rp_pad * P * D),       # out write
    )

    # Grid: (row_block j, batch b) with b innermost so the `add` block index is
    # constant across consecutive steps (no re-fetch per batch).
    out = pl.pallas_call(
        _data_embedding_kernel,
        out_shape=jax.ShapeDtypeStruct((B, Rp_pad, P * D), jnp.float32),
        grid=(J, B),
        in_specs=[
            pl.BlockSpec((None, rp, P * Ctot), lambda j, b: (b, j, 0)),   # x
            pl.BlockSpec((P * Ctot, P * D), lambda j, b: (0, 0)),         # Wpack
            pl.BlockSpec((rp, P * D), lambda j, b: (j, 0)),               # add
        ],
        out_specs=pl.BlockSpec((None, rp, P * D), lambda j, b: (b, j, 0)),
        compiler_params=pltpu.CompilerParams(
            dimension_semantics=("parallel", "parallel")),
        cost_estimate=cost,
    )(x_pack, w_pack, add_pack)

    out = out.reshape(B, Rp_pad * P, D)[:, :R0, :].reshape(B, T, N, D)
    # PyTorch aliasing semantics: xs[0] and xs[1] are the same tensor.
    return out, out


# ---------------------------------------------------------------------------
# Pure-JAX reference (sanity check)
# ---------------------------------------------------------------------------
def reference_forward(x, lap_mx, params, feature_dim):
    B, T, N, _ = x.shape
    D = params["wv"].shape[1]
    val = x[..., :feature_dim] @ params["wv"] + params["bv"]          # (B,T,N,D)
    pe = positional_encoding_table(T, D)[None, :, None, :]            # (1,T,1,D)
    spa = (lap_mx @ params["ws"] + params["bs"])[None, None, :, :]    # (1,1,N,D)
    out = val + pe + 2.0 * spa
    return out, out


# ---------------------------------------------------------------------------
if __name__ == "__main__":
    B, T, N = 2, 8, 16
    feature_dim, embed_dim, lape_dim = 4, 32, 8

    key = jax.random.PRNGKey(0)
    k_x, k_lap, k_p = jax.random.split(key, 3)

    # Input carries 2 extra trailing channels (time-of-day / day-of-week style)
    # which the default forward ignores.
    x = jax.random.normal(k_x, (B, T, N, feature_dim + 2), dtype=jnp.float32)
    lap_mx = jax.random.normal(k_lap, (N, lape_dim), dtype=jnp.float32)
    params = init_params(k_p, feature_dim, embed_dim, lape_dim)

    out0, out1 = data_embedding_forward(x, lap_mx, params, feature_dim)
    jax.block_until_ready((out0, out1))

    ref0, ref1 = reference_forward(x, lap_mx, params, feature_dim)
    np.testing.assert_allclose(np.asarray(out0), np.asarray(ref0), rtol=1e-4, atol=1e-4)
    np.testing.assert_allclose(np.asarray(out1), np.asarray(ref1), rtol=1e-4, atol=1e-4)

    print("KERNEL_OK")
</pallas_src>

<mosaic_0001>
module attributes {stable_mosaic.version = 11 : i64} {
  func.func @_data_embedding_kernel(%arg0: i32, %arg1: i32, %arg2: memref<1x32x24xf32, #tpu.memory_space<vmem>>, %arg3: memref<24x128xf32, #tpu.memory_space<vmem>>, %arg4: memref<32x128xf32, #tpu.memory_space<vmem>>, %arg5: memref<1x32x128xf32, #tpu.memory_space<vmem>>) attributes {dimension_semantics = [#tpu.dimension_semantics<parallel>, #tpu.dimension_semantics<parallel>], iteration_bounds = array<i64: 1, 2>, scalar_prefetch = 0 : i64, scratch_operands = 0 : i64, tpu.core_type = #tpu.core_type<tc>, window_params = [{transform_indices = @transform_0, window_bounds = array<i64: 1, 32, 24>}, {pipeline_mode = #tpu.pipeline_mode<synchronous>, transform_indices = @transform_1, window_bounds = array<i64: 24, 128>}, {transform_indices = @transform_2, window_bounds = array<i64: 32, 128>}, {transform_indices = @transform_3, window_bounds = array<i64: 1, 32, 128>}]} {
    %c0 = arith.constant 0 : index
    %c0_0 = arith.constant 0 : index
    %c0_1 = arith.constant 0 : index
    %0 = vector.load %arg2[%c0, %c0_0, %c0_1] : memref<1x32x24xf32, #tpu.memory_space<vmem>>, vector<1x32x24xf32>
    %1 = vector.shape_cast %0 : vector<1x32x24xf32> to vector<32x24xf32>
    %c0_2 = arith.constant 0 : index
    %c0_3 = arith.constant 0 : index
    %2 = vector.load %arg3[%c0_2, %c0_3] : memref<24x128xf32, #tpu.memory_space<vmem>>, vector<24x128xf32>
    %cst = arith.constant dense<0.000000e+00> : vector<32x128xf32>
    %3 = tpu.matmul %1, %2, %cst {dimension_numbers = #tpu.dot_dimension_numbers<[1], [0], [0], [1], [0, 0, 1, 1], [], []>} : vector<32x24xf32>, vector<24x128xf32>, vector<32x128xf32> -> vector<32x128xf32>
    %c0_4 = arith.constant 0 : index
    %c0_5 = arith.constant 0 : index
    %4 = vector.load %arg4[%c0_4, %c0_5] : memref<32x128xf32, #tpu.memory_space<vmem>>, vector<32x128xf32>
    %5 = arith.addf %3, %4 : vector<32x128xf32>
    %c0_6 = arith.constant 0 : index
    %c0_7 = arith.constant 0 : index
    %c0_8 = arith.constant 0 : index
    %6 = vector.load %arg5[%c0_6, %c0_7, %c0_8] : memref<1x32x128xf32, #tpu.memory_space<vmem>>, vector<1x32x128xf32>
    %7 = vector.shape_cast %6 : vector<1x32x128xf32> to vector<32x128xf32>
    %8 = vector.shape_cast %5 : vector<32x128xf32> to vector<1x32x128xf32>
    tpu.vector_store %arg5[%c0_6, %c0_7, %c0_8], %8 {strides = array<i32>} : memref<1x32x128xf32, #tpu.memory_space<vmem>>, vector<1x32x128xf32>,
    return
  }
  func.func @transform_0(%arg0: i32, %arg1: i32) -> (i32, i32, i32) {
    %c0_i32 = arith.constant 0 : i32
    %c0_i32_0 = arith.constant 0 : i32
    return %arg1, %arg0, %c0_i32 : i32, i32, i32
  }
  func.func @transform_1(%arg0: i32, %arg1: i32) -> (i32, i32) {
    %c0_i32 = arith.constant 0 : i32
    %c0_i32_0 = arith.constant 0 : i32
    %c0_i32_1 = arith.constant 0 : i32
    return %c0_i32, %c0_i32_0 : i32, i32
  }
  func.func @transform_2(%arg0: i32, %arg1: i32) -> (i32, i32) {
    %c0_i32 = arith.constant 0 : i32
    %c0_i32_0 = arith.constant 0 : i32
    return %arg0, %c0_i32 : i32, i32
  }
  func.func @transform_3(%arg0: i32, %arg1: i32) -> (i32, i32, i32) {
    %c0_i32 = arith.constant 0 : i32
    %c0_i32_0 = arith.constant 0 : i32
    return %arg1, %arg0, %c0_i32 : i32, i32, i32
  }
}

</mosaic_0001>

<bundles_post_ra>
// kernel: tpu_custom_call.1
= control target key start
LH: loop header
LB: loop body
LE: loop exit
PB: predicated region body
PF: predicated region fallthrough
CT: control target
= control target key end

     0   :  { %8 = vsyncpa [#allocation3], 0  ;;  %s788_s0 = inlined_call_operand.vmem [shape: f32[2,32,24], index: 0, kind: input, shape index: {}]   ;;  %s789_s1 = inlined_call_operand.vmem [shape: f32[24,128], index: 1, kind: input, shape index: {}]   ;;  %s790_s2 = inlined_call_operand.vmem [shape: f32[32,128], index: 2, kind: input, shape index: {}]   ;;  %s791_s3 = inlined_call_operand.hbm [shape: f32[2,32,128], index: 3, kind: output, shape index: {}]  }
   0x1   :  { %10 = vsyncpa [#allocation3 + $0x1], 0  ;;  %s652_s12 = smov 0   ;;  %s654_s13 = smov 0  }
   0x2   :  { %s656_s14 = smov 0   ;;  %s658_s15 = smov 0  }
   0x3   :  { %s660_s16 = smov 0   ;;  %s662_s17 = smov 0  }
   0x4 LB: > { %s445_s18 = sadd.s32 4294967295, %s627_s17   ;;  %s446_s19 = sadd.s32 4294967294, %s627_s17   ;;  %s627_s17 = sphi %s662_s17, %s16_s17   ;;  %s623_s16 = sphi %s660_s16, %s798_s16   ;;  %s619_s15 = sphi %s658_s15, %s797_s15   ;;  %s615_s14 = sphi %s656_s14, %s796_s14   ;;  %s611_s13 = sphi %s654_s13, %s795_s13   ;;  %s607_s12 = sphi %s652_s12, %s794_s12  }
   0x5   : > { %s25_s20 = sadd.s32 1, %s623_s16  ;;  %s112_s21 = sadd.s32 1, %s615_s14 }
   0x6   : > { %p26_p0 = scmp.ge.s32.totalorder %s25_s20, 2  ;;  %p122_p1 = scmp.ne.s32.totalorder %s615_s14, %s611_s13 }
   0x7   : > { %p123_p2 = scmp.eq.s32.totalorder %s445_s18, 1  ;;  %p128_p3 = scmp.ne.s32.totalorder %s611_s13, %s607_s12 }
   0x8   : > { %s800_s20 = smov (%p26_p0, %s25_s20), 0  ;;  %p129_p5 = scmp.eq.s32.totalorder %s446_s19, 1 }
   0x9   : > { %p692_p4 = por %p123_p2, %p122_p1  ;;  %s107_s23 = ssub.s32 %s623_s16, %s800_s20 }
   0xa   : > { %p450_p6 = scmp.ge.s32.totalorder %s627_s17, 1  ;;  %p110_p7 = scmp.eq.s32.totalorder %s107_s23, 0 }
   0xb   : > { %p699_p8 = por %p129_p5, %p128_p3  ;;  %p172_p9 = scmp.lt.s32.totalorder %s627_s17, 3 }
   0xc   : > { %s705_s25 = scalar_select %p110_p7, %s615_s14, %s112_s21  }
   0xd   : > { %p173_p10 = pnand %p450_p6, %p172_p9 }
   0xe   : > { %v226_v0 = vld [vmem:[%s789_s1] sm:$0xff] (!%p173_p10)  ;;  %v227_v1 = vld [vmem:[%s789_s1 + $0x8] sm:$0xff] (!%p173_p10)  ;;  %p206_p11 = scmp.lt.s32.totalorder (!%p173_p10), %s619_s15, 1  ;;  %v228_v3 = vld [vmem:[%s789_s1 + $0x10] sm:$0xff] (!%p173_p10)  ;;  %vm233_vm0 = vcmask (!%p173_p10), 195584   ;;  %s202_s10 = sand.u32 (!%p173_p10), 1, %s611_s13  }
   0xf   : > { %176 = sbr.rel (%p173_p10) target bundleno = 258 (0x102), region = 32  ;;  %v484_v2 = vpack.c.bf16 (!%p173_p10), %v227_v1, %v226_v0  ;;  %s451_s11 = sshll.u32 (!%p173_p10), %s202_s10, 5  ;;  %v230_v8 = vld [vmem:[%s790_s2 + $0x8] sm:$0xff] (!%p173_p10)  ;;  %v232_v9 = vld [vmem:[%s790_s2 + $0x18] sm:$0xff] (!%p173_p10)  ;;  %v229_v10 = vld [vmem:[%s790_s2] sm:$0xff] (!%p173_p10) }
  0x10   : > { %s204_s21 = scalar_lea.vmem (!%p173_p10), [#allocation2], %s451_s11  ;;  %s464_s28 = sshll.u32 (!%p173_p10), %s619_s15, 9  ;;  %v231_v11 = vld [vmem:[%s790_s2 + $0x10] sm:$0xff] (!%p173_p10) }
  0x11   : > { %485 = vmatprep.subr.bf16.mxu0 (!%p173_p10), %v484_v2  ;;  %488 = vmatprep.subr.bf16.mxu1 (!%p173_p10), %v484_v2  ;;  %s351_s23 = sshll.u32 (!%p173_p10), %s204_s21, 4  ;;  %s740_s7 = scalar_lea.hbm (!%p173_p10), %s791_s3, %s464_s28  ;;  %s735_s23 = int_to_ptr.vmem [resolvable:$true] %s351_s23 }
  0x12   : > { %487 = vmatpush3.bf16.msra.mxu0 (!%p173_p10), %v484_v2  ;;  %490 = vmatpush3.bf16.msra.mxu1 (!%p173_p10), %v484_v2  ;;  %s742_s8 = scalar_lea.sflag (!%p173_p10), [#allocation3], %s202_s10  ;;  %s629_s11 = smov (!%p173_p10), [#allocation2]  }
  0x13   : > { %476 = vmatprep.subr.mxu0 (!%p173_p10), %v228_v3  ;;  %489 = vmatprep.subr.mxu1 (!%p173_p10), %v228_v3  ;;  %s553_s18 = sshll.u32 (!%p173_p10), %s629_s11, 4  ;;  %s554_s18 = int_to_ptr.vmem [resolvable:$false] %s553_s18 }
  0x14   : > { %s555_s19 = scalar_lea.vmem (!%p173_p10), %s554_s18, 1024  ;;  %p556_p1 = scmp.lt.s32.totalorder (!%p173_p10), %s735_s23, %s554_s18 }
  0x16   : > { %s207_s5 = scalar_select %p206_p11, %s619_s15, 1  ;;  %477 = vmatpush3.msra.mxu0 %v228_v3  ;;  %491 = vmatpush3.msra.mxu1 %v228_v3 }
  0x18   : > { %s463_s6 = sshll.u32 %s207_s5, 5 }
  0x19   : > { %s213_s9 = scalar_lea.vmem %s788_s0, %s463_s6 }
  0x1a   : > { %v222_v4 = vld [vmem:[%s213_s9] sm:$0xff]  ;;  %v224_v5 = vld [vmem:[%s213_s9 + $0x10] sm:$0xff]  ;;  %v223_v6 = vld [vmem:[%s213_s9 + $0x8] sm:$0xff] }
  0x1b   : > { %478 = vmatprep.mubr.msk.f32.mxu0 %vm233_vm0, %v222_v4  ;;  %481 = vmatprep.mubr.msk.f32.mxu1 %vm233_vm0, %v224_v5  ;;  %v225_v7 = vld [vmem:[%s213_s9 + $0x18] sm:$0xff]  ;;  %s549_s9 = scalar_lea.vmem %s735_s23, 512 }
  0x1c   : > { %479 = vmatmul.mubr.msk.f32.vlgmr.msra.gmra.mrb[0].mxu0 %vm233_vm0, %v223_v6  ;;  %482 = vmatmul.mubr.msk.f32.vlgmr.msra.gmra.mrb[0].mxu1 %vm233_vm0, %v225_v7  ;;  %p550_p12 = scmp.ne.s32.totalorder %s735_s23, %s549_s9  ;;  %p557_p2 = scmp.lt.s32.totalorder %s555_s19, %s549_s9 }
  0x1e   : > { %p551_p13 = pnand %p550_p12, %p692_p4  ;;  %p558_p3 = por %p557_p2, %p556_p1 }
  0x20   : > { %p552_p0 = pneg %p551_p13 }
  0x22   : > { %p559_p5 = pnand %p558_p3, %p552_p0 }
  0xef   : > { %v480_v12 = vpop.f32.mrb[0].mxu0  ;;  %v483_v13 = vpop.f32.mrb[0].mxu1 }
  0xf0   : > { %v318_v14 = vadd.f32 %v480_v12, %v230_v8  ;;  %v328_v15 = vadd.f32 %v483_v13, %v232_v9  ;;  %v312_v16 = vpop.f32.mrb[1].mxu0  ;;  %v322_v17 = vpop.f32.mrb[1].mxu1 }
  0xf1   : > { %v313_v18 = vadd.f32 %v312_v16, %v229_v10  ;;  %v323_v19 = vadd.f32 %v322_v17, %v231_v11 }
  0xf2   : > { %332 = vst [vmem:[%s204_s21 + $0x8] sm:$0xff] %v318_v14  ;;  %334 = vst [vmem:[%s204_s21 + $0x18] sm:$0xff] %v328_v15 }
  0xf3   : > { %331 = vst [vmem:[%s204_s21] sm:$0xff] %v313_v18  ;;  %333 = vst [vmem:[%s204_s21 + $0x10] sm:$0xff] %v323_v19 }
  0xf4   : > { %562 = shalt.err (!%p559_p5)
}
  0xf5   : > { %s563_s10 = scalar_lea.hbm %s740_s7, 512  ;;  %s567_s27 = scalar_lea.hbm %s791_s3, 1024 }
  0xf6   : > { %p564_p6 = scmp.ne.s32.totalorder %s740_s7, %s563_s10  ;;  %p568_p10 = scmp.lt.u32.totalorder %s740_s7, %s791_s3 }
  0xf7   : > { %p569_p11 = scmp.lt.u32.totalorder %s567_s27, %s563_s10  ;;  %p571_p13 = scmp.lt.u32.totalorder %s563_s10, %s740_s7 }
  0xf8   : > { %p565_p7 = pnand %p564_p6, %p692_p4 }
  0xf9   : > { %p570_p12 = por %p569_p11, %p568_p10 }
  0xfa   : > { %p566_p9 = pneg %p565_p7 }
  0xfb   : > { %p572_p0 = por %p571_p13, %p570_p12 }
  0xfd   : > { %p573_p1 = pnand %p572_p0, %p566_p9 }
  0xff   : > { %576 = shalt.err (!%p573_p1)
}
 0x100   : > { %s630_s30 = smov 128   ;;  %s631_s4 = smov 8  }
 0x101   : > { %492 = dma.vmem_to_hbm [thread:$0]  (%p692_p4), %s735_s23, 512, %s740_s7, %s742_s8, %s630_s30, %s630_s30, %s631_s4  }
 0x102 PF: > { %p498_p2 = scmp.ge.s32.totalorder %s627_s17, 2  ;;  %s366_s5 = sand.u32 1, %s607_s12  }
 0x103   : > { %s367_s15 = scalar_lea.sflag [#allocation3], %s366_s5 }
 0x104   : > { %p495_p3 = pnand %p498_p2, %p699_p8 }
 0x106   : > { %602 = dma.done.wait (!%p495_p3), %s367_s15, 512  }
 0x107   : > { %604 = vsyncadd (!%p495_p3), %s367_s15, 4294966784  ;;  %s16_s17 = sadd.s32 1, %s627_s17   ;;  %s794_s12 = smov %s611_s13 }
 0x108   : > { %p13_p5 = scmp.ge.s32.totalorder %s16_s17, 4   ;;  %s795_s13 = smov %s615_s14 }
 0x109   : > { %s796_s14 = smov %s705_s25  ;;  %s797_s15 = smov %s623_s16 }
 0x10a   : > { %s798_s16 = smov %s800_s20  ;;  %15 = sbr.rel (!%p13_p5) target bundleno = 4 (0x4), region = 70 }
 0x111   :  { %372 = vsyncpa [#allocation3], 1 }
 0x112   :  { %374 = vsyncpa [#allocation3 + $0x1], 1 }

</bundles_post_ra>
